<compile_context>
chip_gen: v5e
topology: v5e:2x2
jax: 0.10.0
libtpu: 0.0.40
codegen_flags: <defaults>
</compile_context>

<pallas_src>
import functools

import jax
import jax.numpy as jnp
from jax.experimental import pallas as pl
from jax.experimental.pallas import tpu as pltpu


def _sigmoid(x):
    # Exact identity for the logistic function using only tanh (EUP slot).
    return 0.5 * (jnp.tanh(0.5 * x) + 1.0)


def _round_up(x, m):
    return ((x + m - 1) // m) * m


def _lstm_dense_kernel(T, Bp, x_ref, len_ref, wih_ref, whh_ref, bg_ref,
                       wd_ref, bd_ref, h0_ref, c0_ref,
                       logits_ref, hn_ref, cn_ref,
                       h_sc, c_sc, xg_sc, out_sc):
    Hp = h0_ref.shape[-1]

    # Hoisted input projection + gate bias for ALL timesteps: one big MXU call.
    xg_sc[...] = (jnp.dot(x_ref[...], wih_ref[...],
                          preferred_element_type=jnp.float32) + bg_ref[...])

    h_sc[...] = h0_ref[...]
    c_sc[...] = c0_ref[...]
    lens = len_ref[...]                               # (Bp, 1) int32

    # Time recurrence inside the kernel (no per-step grid / DMA overhead).
    @pl.loop(0, T)
    def _(t):
        rows = pl.ds(pl.multiple_of(t * Bp, Bp), Bp)  # sublane-aligned row block
        h = h_sc[...]                                 # (Bp, Hp)
        c = c_sc[...]                                 # (Bp, Hp)

        gates = xg_sc[rows, :] + jnp.dot(h, whh_ref[...],
                                         preferred_element_type=jnp.float32)

        # PyTorch gate order: i, f, g, o. Hp is a multiple of 128 so every
        # slice is lane-aligned (no cross-lane relayout on the serial path).
        i_g = _sigmoid(gates[:, 0 * Hp:1 * Hp])
        f_g = _sigmoid(gates[:, 1 * Hp:2 * Hp])
        g_g = jnp.tanh(gates[:, 2 * Hp:3 * Hp])
        o_g = _sigmoid(gates[:, 3 * Hp:4 * Hp])

        c_new = f_g * c + i_g * g_g
        h_new = o_g * jnp.tanh(c_new)

        # pack_padded_sequence: rows with t >= lengths[b] are not processed.
        mask = t < lens                               # (Bp, 1) bool
        h_sc[...] = jnp.where(mask, h_new, h)
        c_sc[...] = jnp.where(mask, c_new, c)
        out_sc[rows, :] = jnp.where(mask, h_new, 0.0)  # pad_packed zero-fill

    # Dense head hoisted out of the recurrence: one (T*Bp,Hp)@(Hp,Op) matmul,
    # lane-dense (Op multiple of 128) writeback. Dropout == identity (eval).
    logits_ref[...] = (jnp.dot(out_sc[...], wd_ref[...],
                               preferred_element_type=jnp.float32)
                       + bd_ref[...]).astype(logits_ref.dtype)

    hn_ref[...] = h_sc[...]
    cn_ref[...] = c_sc[...]


def rnn_layer_forward(inputs, hx, cx, lengths, params):
    """inputs (T,B,I) f32, hx/cx (1,B,H) f32, lengths (B,) int -> (logits, h_n, c_n)."""
    # TODO(synk): only num_layers == 1 is implemented (the module's default).
    T, B, I = inputs.shape
    H = params["w_hh"].shape[1]
    O = params["w_d"].shape[0]
    f32 = jnp.float32

    Bp = _round_up(B, 8)      # sublane alignment
    Hp = _round_up(H, 128)    # lane alignment for gate slices / hidden state
    Op = _round_up(O, 128)    # lane-dense logits writeback

    # Per-gate zero-padding of the LSTM weights (gate order i, f, g, o).
    w_ih = params["w_ih"].astype(f32).reshape(4, H, I)
    w_ih_t = jnp.zeros((4, Hp, I), f32).at[:, :H, :].set(w_ih)
    w_ih_t = w_ih_t.reshape(4 * Hp, I).T                             # (I, 4Hp)

    w_hh = params["w_hh"].astype(f32).reshape(4, H, H)
    w_hh_t = jnp.zeros((4, Hp, Hp), f32).at[:, :H, :H].set(w_hh)
    w_hh_t = w_hh_t.reshape(4 * Hp, Hp).T                            # (Hp, 4Hp)

    b = (params["b_ih"] + params["b_hh"]).astype(f32).reshape(4, H)
    b_gates = jnp.zeros((4, Hp), f32).at[:, :H].set(b).reshape(1, 4 * Hp)

    w_d_t = jnp.zeros((Hp, Op), f32).at[:H, :O].set(params["w_d"].astype(f32).T)
    b_d = jnp.zeros((1, Op), f32).at[0, :O].set(params["b_d"].astype(f32))

    # Batch padding (padded rows get length 0 -> frozen at zero state).
    x2d = (jnp.zeros((T, Bp, I), f32).at[:, :B, :].set(inputs.astype(f32))
           .reshape(T * Bp, I))
    h0 = jnp.zeros((Bp, Hp), f32).at[:B, :H].set(hx[0].astype(f32))
    c0 = jnp.zeros((Bp, Hp), f32).at[:B, :H].set(cx[0].astype(f32))
    len2d = jnp.zeros((Bp, 1), jnp.int32).at[:B, 0].set(lengths.astype(jnp.int32))

    def vmem_spec():
        return pl.BlockSpec(memory_space=pltpu.MemorySpace.VMEM)

    logits_flat, h_n, c_n = pl.pallas_call(
        functools.partial(_lstm_dense_kernel, T, Bp),
        out_shape=(jax.ShapeDtypeStruct((T * Bp, Op), f32),
                   jax.ShapeDtypeStruct((Bp, Hp), f32),
                   jax.ShapeDtypeStruct((Bp, Hp), f32)),
        in_specs=[vmem_spec() for _ in range(9)],
        out_specs=(vmem_spec(), vmem_spec(), vmem_spec()),
        scratch_shapes=[pltpu.VMEM((Bp, Hp), f32),            # h state
                        pltpu.VMEM((Bp, Hp), f32),            # c state
                        pltpu.VMEM((T * Bp, 4 * Hp), f32),    # precomputed x-gates
                        pltpu.VMEM((T * Bp, Hp), f32)],       # masked h_t stage
    )(x2d, len2d, w_ih_t, w_hh_t, b_gates, w_d_t, b_d, h0, c0)

    logits = logits_flat.reshape(T, Bp, Op)[:, :B, :O]
    return logits, h_n[:B, :H][None], c_n[:B, :H][None]


def ref_forward(inputs, hx, cx, lengths, params):
    """Pure-JAX reference mirroring packed nn.LSTM + Linear (eval mode)."""
    T, B, I = inputs.shape
    H = params["w_hh"].shape[1]
    w_ih, w_hh = params["w_ih"], params["w_hh"]
    b = params["b_ih"] + params["b_hh"]

    def step(carry, xt_t):
        h, c = carry
        xt, t = xt_t
        gates = xt @ w_ih.T + h @ w_hh.T + b
        i = _sigmoid(gates[:, :H])
        f = _sigmoid(gates[:, H:2 * H])
        g = jnp.tanh(gates[:, 2 * H:3 * H])
        o = _sigmoid(gates[:, 3 * H:])
        c_new = f * c + i * g
        h_new = o * jnp.tanh(c_new)
        mask = (t < lengths)[:, None]
        return ((jnp.where(mask, h_new, h), jnp.where(mask, c_new, c)),
                jnp.where(mask, h_new, 0.0))

    (h_n, c_n), outs = jax.lax.scan(step, (hx[0], cx[0]),
                                    (inputs, jnp.arange(T)))
    logits = outs @ params["w_d"].T + params["b_d"]
    return logits, h_n[None], c_n[None]


if __name__ == "__main__":
    T, B, I, H, O = 8, 4, 8, 32, 16
    key = jax.random.PRNGKey(0)
    ks = jax.random.split(key, 8)

    k_lstm = 1.0 / jnp.sqrt(H)
    params = {
        "w_ih": jax.random.uniform(ks[0], (4 * H, I), jnp.float32, -k_lstm, k_lstm),
        "w_hh": jax.random.uniform(ks[1], (4 * H, H), jnp.float32, -k_lstm, k_lstm),
        "b_ih": jax.random.uniform(ks[2], (4 * H,), jnp.float32, -k_lstm, k_lstm),
        "b_hh": jax.random.uniform(ks[3], (4 * H,), jnp.float32, -k_lstm, k_lstm),
        "w_d": jax.random.uniform(ks[4], (O, H), jnp.float32, -k_lstm, k_lstm),
        "b_d": jax.random.uniform(ks[5], (O,), jnp.float32, -k_lstm, k_lstm),
    }

    inputs = jax.random.normal(ks[6], (T, B, I), jnp.float32)
    hx = jnp.zeros((1, B, H), jnp.float32)   # init_states
    cx = jnp.zeros((1, B, H), jnp.float32)
    lengths = jnp.array([8, 6, 5, 3], jnp.int32)   # sorted descending (enforce_sorted)

    logits, h_n, c_n = rnn_layer_forward(inputs, hx, cx, lengths, params)
    jax.block_until_ready((logits, h_n, c_n))

    r_logits, r_hn, r_cn = ref_forward(inputs, hx, cx, lengths, params)
    assert logits.shape == (T, B, O) and h_n.shape == (1, B, H) and c_n.shape == (1, B, H)
    assert jnp.allclose(logits, r_logits, rtol=1e-5, atol=1e-5)
    assert jnp.allclose(h_n, r_hn, rtol=1e-5, atol=1e-5)
    assert jnp.allclose(c_n, r_cn, rtol=1e-5, atol=1e-5)
    print("KERNEL_OK")
</pallas_src>

<mosaic_0001>
module attributes {stable_mosaic.version = 11 : i64} {
  func.func @_lstm_dense_kernel(%arg0: memref<64x8xf32, #tpu.memory_space<vmem>>, %arg1: memref<8x1xi32, #tpu.memory_space<vmem>>, %arg2: memref<8x512xf32, #tpu.memory_space<vmem>>, %arg3: memref<128x512xf32, #tpu.memory_space<vmem>>, %arg4: memref<1x512xf32, #tpu.memory_space<vmem>>, %arg5: memref<128x128xf32, #tpu.memory_space<vmem>>, %arg6: memref<1x128xf32, #tpu.memory_space<vmem>>, %arg7: memref<8x128xf32, #tpu.memory_space<vmem>>, %arg8: memref<8x128xf32, #tpu.memory_space<vmem>>, %arg9: memref<64x128xf32, #tpu.memory_space<vmem>>, %arg10: memref<8x128xf32, #tpu.memory_space<vmem>>, %arg11: memref<8x128xf32, #tpu.memory_space<vmem>>, %arg12: memref<8x128xf32, #tpu.memory_space<vmem>>, %arg13: memref<8x128xf32, #tpu.memory_space<vmem>>, %arg14: memref<64x512xf32, #tpu.memory_space<vmem>>, %arg15: memref<64x128xf32, #tpu.memory_space<vmem>>) attributes {dimension_semantics = [], scalar_prefetch = 0 : i64, scratch_operands = 4 : i64, tpu.core_type = #tpu.core_type<tc>} {
    %c0 = arith.constant 0 : index
    %c0_0 = arith.constant 0 : index
    %0 = vector.load %arg0[%c0, %c0_0] : memref<64x8xf32, #tpu.memory_space<vmem>>, vector<64x8xf32>
    %c0_1 = arith.constant 0 : index
    %c0_2 = arith.constant 0 : index
    %1 = vector.load %arg2[%c0_1, %c0_2] : memref<8x512xf32, #tpu.memory_space<vmem>>, vector<8x512xf32>
    %cst = arith.constant dense<0.000000e+00> : vector<64x512xf32>
    %2 = tpu.matmul %0, %1, %cst {dimension_numbers = #tpu.dot_dimension_numbers<[1], [0], [0], [1], [0, 0, 1, 1], [], []>} : vector<64x8xf32>, vector<8x512xf32>, vector<64x512xf32> -> vector<64x512xf32>
    %c0_3 = arith.constant 0 : index
    %c0_4 = arith.constant 0 : index
    %3 = vector.load %arg4[%c0_3, %c0_4] : memref<1x512xf32, #tpu.memory_space<vmem>>, vector<1x512xf32>
    %4 = vector.broadcast %3 : vector<1x512xf32> to vector<64x512xf32>
    %5 = arith.addf %2, %4 : vector<64x512xf32>
    %c0_5 = arith.constant 0 : index
    %c0_6 = arith.constant 0 : index
    %6 = vector.load %arg14[%c0_5, %c0_6] : memref<64x512xf32, #tpu.memory_space<vmem>>, vector<64x512xf32>
    tpu.vector_store %arg14[%c0_5, %c0_6], %5 {strides = array<i32>} : memref<64x512xf32, #tpu.memory_space<vmem>>, vector<64x512xf32>,
    %c0_7 = arith.constant 0 : index
    %c0_8 = arith.constant 0 : index
    %7 = vector.load %arg7[%c0_7, %c0_8] : memref<8x128xf32, #tpu.memory_space<vmem>>, vector<8x128xf32>
    %c0_9 = arith.constant 0 : index
    %c0_10 = arith.constant 0 : index
    %8 = vector.load %arg12[%c0_9, %c0_10] : memref<8x128xf32, #tpu.memory_space<vmem>>, vector<8x128xf32>
    tpu.vector_store %arg12[%c0_9, %c0_10], %7 {strides = array<i32>} : memref<8x128xf32, #tpu.memory_space<vmem>>, vector<8x128xf32>,
    %c0_11 = arith.constant 0 : index
    %c0_12 = arith.constant 0 : index
    %9 = vector.load %arg8[%c0_11, %c0_12] : memref<8x128xf32, #tpu.memory_space<vmem>>, vector<8x128xf32>
    %c0_13 = arith.constant 0 : index
    %c0_14 = arith.constant 0 : index
    %10 = vector.load %arg13[%c0_13, %c0_14] : memref<8x128xf32, #tpu.memory_space<vmem>>, vector<8x128xf32>
    tpu.vector_store %arg13[%c0_13, %c0_14], %9 {strides = array<i32>} : memref<8x128xf32, #tpu.memory_space<vmem>>, vector<8x128xf32>,
    %c0_15 = arith.constant 0 : index
    %c0_16 = arith.constant 0 : index
    %11 = vector.load %arg1[%c0_15, %c0_16] : memref<8x1xi32, #tpu.memory_space<vmem>>, vector<8x1xi32>
    %c0_i32 = arith.constant 0 : i32
    %c8_i32 = arith.constant 8 : i32
    %12 = arith.addi %c0_i32, %c8_i32 : i32
    %c1_i32 = arith.constant 1 : i32
    scf.for %arg16 = %c0_i32 to %12 step %c1_i32  : i32 {
      %c1_i32_35 = arith.constant 1 : i32
      %24 = arith.muli %arg16, %c1_i32_35 : i32
      %c0_i32_36 = arith.constant 0 : i32
      %25 = arith.addi %c0_i32_36, %24 : i32
      %c8_i32_37 = arith.constant 8 : i32
      %26 = arith.muli %25, %c8_i32_37 : i32
      %27 = tpu.assume_multiple %26, 8 : i32
      %c0_38 = arith.constant 0 : index
      %c0_39 = arith.constant 0 : index
      %28 = vector.load %arg12[%c0_38, %c0_39] : memref<8x128xf32, #tpu.memory_space<vmem>>, vector<8x128xf32>
      %c0_40 = arith.constant 0 : index
      %c0_41 = arith.constant 0 : index
      %29 = vector.load %arg13[%c0_40, %c0_41] : memref<8x128xf32, #tpu.memory_space<vmem>>, vector<8x128xf32>
      %30 = arith.index_cast %27 : i32 to index
      %c0_42 = arith.constant 0 : index
      %31 = vector.load %arg14[%30, %c0_42] : memref<64x512xf32, #tpu.memory_space<vmem>>, vector<8x512xf32>
      %c0_43 = arith.constant 0 : index
      %c0_44 = arith.constant 0 : index
      %32 = vector.load %arg3[%c0_43, %c0_44] : memref<128x512xf32, #tpu.memory_space<vmem>>, vector<128x512xf32>
      %cst_45 = arith.constant dense<0.000000e+00> : vector<8x512xf32>
      %33 = tpu.matmul %28, %32, %cst_45 {dimension_numbers = #tpu.dot_dimension_numbers<[1], [0], [0], [1], [0, 0, 1, 1], [], []>} : vector<8x128xf32>, vector<128x512xf32>, vector<8x512xf32> -> vector<8x512xf32>
      %34 = arith.addf %31, %33 : vector<8x512xf32>
      %35 = vector.extract_strided_slice %34 {offsets = [0, 0], sizes = [8, 128], strides = [1, 1]} : vector<8x512xf32> to vector<8x128xf32>
      %cst_46 = arith.constant 5.000000e-01 : f32
      %36 = vector.broadcast %cst_46 : f32 to vector<8x128xf32>
      %37 = arith.mulf %36, %35 : vector<8x128xf32>
      %38 = math.tanh %37 : vector<8x128xf32>
      %cst_47 = arith.constant 1.000000e+00 : f32
      %39 = vector.broadcast %cst_47 : f32 to vector<8x128xf32>
      %40 = arith.addf %38, %39 : vector<8x128xf32>
      %cst_48 = arith.constant 5.000000e-01 : f32
      %41 = vector.broadcast %cst_48 : f32 to vector<8x128xf32>
      %42 = arith.mulf %41, %40 : vector<8x128xf32>
      %43 = vector.extract_strided_slice %34 {offsets = [0, 128], sizes = [8, 128], strides = [1, 1]} : vector<8x512xf32> to vector<8x128xf32>
      %cst_49 = arith.constant 5.000000e-01 : f32
      %44 = vector.broadcast %cst_49 : f32 to vector<8x128xf32>
      %45 = arith.mulf %44, %43 : vector<8x128xf32>
      %46 = math.tanh %45 : vector<8x128xf32>
      %cst_50 = arith.constant 1.000000e+00 : f32
      %47 = vector.broadcast %cst_50 : f32 to vector<8x128xf32>
      %48 = arith.addf %46, %47 : vector<8x128xf32>
      %cst_51 = arith.constant 5.000000e-01 : f32
      %49 = vector.broadcast %cst_51 : f32 to vector<8x128xf32>
      %50 = arith.mulf %49, %48 : vector<8x128xf32>
      %51 = vector.extract_strided_slice %34 {offsets = [0, 256], sizes = [8, 128], strides = [1, 1]} : vector<8x512xf32> to vector<8x128xf32>
      %52 = math.tanh %51 : vector<8x128xf32>
      %53 = vector.extract_strided_slice %34 {offsets = [0, 384], sizes = [8, 128], strides = [1, 1]} : vector<8x512xf32> to vector<8x128xf32>
      %cst_52 = arith.constant 5.000000e-01 : f32
      %54 = vector.broadcast %cst_52 : f32 to vector<8x128xf32>
      %55 = arith.mulf %54, %53 : vector<8x128xf32>
      %56 = math.tanh %55 : vector<8x128xf32>
      %cst_53 = arith.constant 1.000000e+00 : f32
      %57 = vector.broadcast %cst_53 : f32 to vector<8x128xf32>
      %58 = arith.addf %56, %57 : vector<8x128xf32>
      %cst_54 = arith.constant 5.000000e-01 : f32
      %59 = vector.broadcast %cst_54 : f32 to vector<8x128xf32>
      %60 = arith.mulf %59, %58 : vector<8x128xf32>
      %61 = arith.mulf %50, %29 : vector<8x128xf32>
      %62 = arith.mulf %42, %52 : vector<8x128xf32>
      %63 = arith.addf %61, %62 : vector<8x128xf32>
      %64 = math.tanh %63 : vector<8x128xf32>
      %65 = arith.mulf %60, %64 : vector<8x128xf32>
      %66 = vector.broadcast %25 : i32 to vector<8x1xi32>
      %67 = arith.cmpi slt, %66, %11 : vector<8x1xi32>
      %68 = vector.shape_cast %67 : vector<8x1xi1> to vector<8x1xi1>
      %69 = vector.broadcast %68 : vector<8x1xi1> to vector<8x128xi1>
      %70 = arith.select %69, %65, %28 : vector<8x128xi1>, vector<8x128xf32>
      %c0_55 = arith.constant 0 : index
      %c0_56 = arith.constant 0 : index
      %71 = vector.load %arg12[%c0_55, %c0_56] : memref<8x128xf32, #tpu.memory_space<vmem>>, vector<8x128xf32>
      tpu.vector_store %arg12[%c0_55, %c0_56], %70 {strides = array<i32>} : memref<8x128xf32, #tpu.memory_space<vmem>>, vector<8x128xf32>,
      %72 = vector.shape_cast %67 : vector<8x1xi1> to vector<8x1xi1>
      %73 = vector.broadcast %72 : vector<8x1xi1> to vector<8x128xi1>
      %74 = arith.select %73, %63, %29 : vector<8x128xi1>, vector<8x128xf32>
      %c0_57 = arith.constant 0 : index
      %c0_58 = arith.constant 0 : index
      %75 = vector.load %arg13[%c0_57, %c0_58] : memref<8x128xf32, #tpu.memory_space<vmem>>, vector<8x128xf32>
      tpu.vector_store %arg13[%c0_57, %c0_58], %74 {strides = array<i32>} : memref<8x128xf32, #tpu.memory_space<vmem>>, vector<8x128xf32>,
      %cst_59 = arith.constant 0.000000e+00 : f32
      %76 = vector.shape_cast %67 : vector<8x1xi1> to vector<8x1xi1>
      %77 = vector.broadcast %76 : vector<8x1xi1> to vector<8x128xi1>
      %78 = vector.broadcast %cst_59 : f32 to vector<8x128xf32>
      %79 = arith.select %77, %65, %78 : vector<8x128xi1>, vector<8x128xf32>
      %80 = arith.index_cast %27 : i32 to index
      %c0_60 = arith.constant 0 : index
      %81 = vector.load %arg15[%80, %c0_60] : memref<64x128xf32, #tpu.memory_space<vmem>>, vector<8x128xf32>
      tpu.vector_store %arg15[%80, %c0_60], %79 {strides = array<i32>} : memref<64x128xf32, #tpu.memory_space<vmem>>, vector<8x128xf32>,
    }
    %c8_i32_17 = arith.constant 8 : i32
    %c0_18 = arith.constant 0 : index
    %c0_19 = arith.constant 0 : index
    %13 = vector.load %arg15[%c0_18, %c0_19] : memref<64x128xf32, #tpu.memory_space<vmem>>, vector<64x128xf32>
    %c0_20 = arith.constant 0 : index
    %c0_21 = arith.constant 0 : index
    %14 = vector.load %arg5[%c0_20, %c0_21] : memref<128x128xf32, #tpu.memory_space<vmem>>, vector<128x128xf32>
    %cst_22 = arith.constant dense<0.000000e+00> : vector<64x128xf32>
    %15 = tpu.matmul %13, %14, %cst_22 {dimension_numbers = #tpu.dot_dimension_numbers<[1], [0], [0], [1], [0, 0, 1, 1], [], []>} : vector<64x128xf32>, vector<128x128xf32>, vector<64x128xf32> -> vector<64x128xf32>
    %c0_23 = arith.constant 0 : index
    %c0_24 = arith.constant 0 : index
    %16 = vector.load %arg6[%c0_23, %c0_24] : memref<1x128xf32, #tpu.memory_space<vmem>>, vector<1x128xf32>
    %17 = vector.broadcast %16 : vector<1x128xf32> to vector<64x128xf32>
    %18 = arith.addf %15, %17 : vector<64x128xf32>
    %c0_25 = arith.constant 0 : index
    %c0_26 = arith.constant 0 : index
    %19 = vector.load %arg9[%c0_25, %c0_26] : memref<64x128xf32, #tpu.memory_space<vmem>>, vector<64x128xf32>
    tpu.vector_store %arg9[%c0_25, %c0_26], %18 {strides = array<i32>} : memref<64x128xf32, #tpu.memory_space<vmem>>, vector<64x128xf32>,
    %c0_27 = arith.constant 0 : index
    %c0_28 = arith.constant 0 : index
    %20 = vector.load %arg12[%c0_27, %c0_28] : memref<8x128xf32, #tpu.memory_space<vmem>>, vector<8x128xf32>
    %c0_29 = arith.constant 0 : index
    %c0_30 = arith.constant 0 : index
    %21 = vector.load %arg10[%c0_29, %c0_30] : memref<8x128xf32, #tpu.memory_space<vmem>>, vector<8x128xf32>
    tpu.vector_store %arg10[%c0_29, %c0_30], %20 {strides = array<i32>} : memref<8x128xf32, #tpu.memory_space<vmem>>, vector<8x128xf32>,
    %c0_31 = arith.constant 0 : index
    %c0_32 = arith.constant 0 : index
    %22 = vector.load %arg13[%c0_31, %c0_32] : memref<8x128xf32, #tpu.memory_space<vmem>>, vector<8x128xf32>
    %c0_33 = arith.constant 0 : index
    %c0_34 = arith.constant 0 : index
    %23 = vector.load %arg11[%c0_33, %c0_34] : memref<8x128xf32, #tpu.memory_space<vmem>>, vector<8x128xf32>
    tpu.vector_store %arg11[%c0_33, %c0_34], %22 {strides = array<i32>} : memref<8x128xf32, #tpu.memory_space<vmem>>, vector<8x128xf32>,
    return
  }
}

</mosaic_0001>

<bundles_post_ra>
// kernel: tpu_custom_call.1
= control target key start
LH: loop header
LB: loop body
LE: loop exit
PB: predicated region body
PF: predicated region fallthrough
CT: control target
= control target key end

     0   :  { %17 = vsyncpa [#allocation7], 0  ;;  %s1144_s0 = inlined_call_operand.vmem [shape: f32[64,8], index: 0, kind: input, shape index: {}]   ;;  %s1145_s1 = inlined_call_operand.vmem [shape: s32[8,1], index: 1, kind: input, shape index: {}]   ;;  %s1146_s2 = inlined_call_operand.vmem [shape: f32[8,512], index: 2, kind: input, shape index: {}]   ;;  %s1147_s3 = inlined_call_operand.hbm [shape: f32[128,512], index: 3, kind: input, shape index: {}]   ;;  %s1148_s4 = inlined_call_operand.vmem [shape: f32[1,512], index: 4, kind: input, shape index: {}]   ;;  %s1149_s5 = inlined_call_operand.hbm [shape: f32[128,128], index: 5, kind: input, shape index: {}]   ;;  %s1150_s6 = inlined_call_operand.vmem [shape: f32[1,128], index: 6, kind: input, shape index: {}]   ;;  %s1151_s7 = inlined_call_operand.vmem [shape: f32[8,128], index: 7, kind: input, shape index: {}]   ;;  %s1152_s8 = inlined_call_operand.vmem [shape: f32[8,128], index: 8, kind: input, shape index: {}]   ;;  %s1153_s9 = inlined_call_operand.hbm [shape: f32[64,128], index: 9, kind: output, shape index: {0}]   ;;  %s1154_s10 = inlined_call_operand.hbm [shape: f32[8,128], index: 10, kind: output, shape index: {1}]   ;;  %s1155_s11 = inlined_call_operand.hbm [shape: f32[8,128], index: 11, kind: output, shape index: {2}]  }
   0x1   :  { %18 = vsyncpa [#allocation10], 0 }
   0x2   :  { %19 = vsyncpa [#allocation8], 0 }
   0x3   :  { %20 = vsyncpa [#allocation13], 0  ;;  %s31_s19 = sshll.u32 %s1147_s3, 4  ;;  %s906_s20 = smov [#allocation6]   ;;  %s32_s19 = int_to_ptr.hbm [resolvable:$true] %s31_s19 }
   0x4   :  { %s33_s21 = sshll.u32 %s906_s20, 4  ;;  %s46_s24 = sshll.u32 %s1149_s5, 4  ;;  %s34_s21 = int_to_ptr.vmem [resolvable:$true] %s33_s21  ;;  %s47_s24 = int_to_ptr.hbm [resolvable:$true] %s46_s24 }
   0x5   :  { %s907_s25 = smov 512   ;;  %s908_s26 = smov 32  }
   0x6   :  { %39 = dma.hbm_to_vmem [thread:$0]  %s32_s19, 8192, %s34_s21, [#allocation7], %s907_s25, %s907_s25, %s908_s26  }
   0x7   :  { %s909_s27 = smov [#allocation9]   ;;  %s910_s29 = smov 128  }
   0x8   :  { %s48_s28 = sshll.u32 %s909_s27, 4  ;;  %s911_s30 = smov 8   ;;  %s49_s28 = int_to_ptr.vmem [resolvable:$true] %s48_s28 }
   0x9   :  { %54 = dma.hbm_to_vmem [thread:$0]  %s47_s24, 2048, %s49_s28, [#allocation10], %s910_s29, %s910_s29, %s911_s30  }
   0xa   :  { %894 = dma.done.wait [#allocation7], 8192  }
   0xb   :  { %895 = vsyncadd [#allocation7], 4294959104 }
   0xc   :  { %896 = dma.done.wait [#allocation10], 2048  }
   0xd   :  { %897 = vsyncadd [#allocation10], 4294965248  ;;  %v312_v0 = vld [vmem:[%s1151_s7] sm:$0xff]  ;;  %vm91_vm0 = vcmask 64512   ;;  %v79_v3 = vld [vmem:[%s1146_s2 + $0x10] sm:$0xff] }
   0xe   :  { %v314_v1 = vld [vmem:[%s1152_s8] sm:$0xff]  ;;  %313 = vst [vmem:[#allocation2] sm:$0xff] %v312_v0  ;;  %v80_v4 = vld [vmem:[%s1146_s2 + $0x18] sm:$0xff]  ;;  %213 = vmatpush.msra.mxu2 %v79_v3  ;;  %v78_v7 = vld [vmem:[%s1146_s2 + $0x8] sm:$0xff] }
   0xf   :  { %v994_v2 = vld [vmem:[%s1145_s1] sm:$0xff]  ;;  %315 = vst [vmem:[#allocation3] sm:$0xff] %v314_v1  ;;  %254 = vmatpush.msra.mxu3 %v80_v4  ;;  %172 = vmatpush.msra.mxu1 %v78_v7  ;;  %v70_v8 = vld [vmem:[%s1144_s0 + $0x8] sm:$0xff]  ;;  %v71_v9 = vld [vmem:[%s1144_s0 + $0x10] sm:$0xff] }
  0x10   :  { %v69_v5 = vld [vmem:[%s1144_s0] sm:$0xff]  ;;  %v72_v10 = vld [vmem:[%s1144_s0 + $0x18] sm:$0xff]  ;;  %v74_v12 = vld [vmem:[%s1144_s0 + $0x28] sm:$0xff] }
  0x11   :  { %v77_v6 = vld [vmem:[%s1146_s2] sm:$0xff]  ;;  %672 = vmatmul.msk.f32.vlgmr.msra.gmra.mxu2 %vm91_vm0, %v69_v5  ;;  %680 = vmatmul.msk.f32.vlgmr.msra.gmra.mxu3 %vm91_vm0, %v69_v5  ;;  %v75_v13 = vld [vmem:[%s1144_s0 + $0x30] sm:$0xff]  ;;  %v76_v14 = vld [vmem:[%s1144_s0 + $0x38] sm:$0xff] }
  0x12   :  { %131 = vmatpush.msra.mxu0 %v77_v6  ;;  %664 = vmatmul.msk.f32.vlgmr.msra.gmra.mxu1 %vm91_vm0, %v69_v5  ;;  %v73_v11 = vld [vmem:[%s1144_s0 + $0x20] sm:$0xff]  ;;  %s1107_s0 = smov 0  }
  0x13   :  { %656 = vmatmul.msk.f32.vlgmr.msra.gmra.mxu0 %vm91_vm0, %v69_v5  ;;  %v81_v15 = vld [vmem:[%s1148_s4] sm:$0xf] }
  0x14   :  { %v1067_v16 = vperm.slane %v81_v15, 0  ;;  %v1069_v17 = vperm.slane %v81_v15, 1  ;;  %v1073_v22 = vperm.slane %v81_v15, 2  ;;  %v1075_v23 = vperm.slane %v81_v15, 3 }
  0x19   :  { %673 = vmatmul.msk.f32.gmra.mxu2 %vm91_vm0, %v70_v8  ;;  %681 = vmatmul.msk.f32.gmra.mxu3 %vm91_vm0, %v70_v8 }
  0x1a   :  { %665 = vmatmul.msk.f32.gmra.mxu1 %vm91_vm0, %v70_v8 }
  0x1b   :  { %657 = vmatmul.msk.f32.gmra.mxu0 %vm91_vm0, %v70_v8 }
  0x21   :  { %674 = vmatmul.msk.f32.gmra.mxu2 %vm91_vm0, %v71_v9  ;;  %682 = vmatmul.msk.f32.gmra.mxu3 %vm91_vm0, %v71_v9 }
  0x22   :  { %666 = vmatmul.msk.f32.gmra.mxu1 %vm91_vm0, %v71_v9 }
  0x23   :  { %658 = vmatmul.msk.f32.gmra.mxu0 %vm91_vm0, %v71_v9 }
  0x29   :  { %675 = vmatmul.msk.f32.gmra.mxu2 %vm91_vm0, %v72_v10  ;;  %683 = vmatmul.msk.f32.gmra.mxu3 %vm91_vm0, %v72_v10 }
  0x2a   :  { %667 = vmatmul.msk.f32.gmra.mxu1 %vm91_vm0, %v72_v10 }
  0x2b   :  { %659 = vmatmul.msk.f32.gmra.mxu0 %vm91_vm0, %v72_v10 }
  0x31   :  { %676 = vmatmul.msk.f32.gmra.mxu2 %vm91_vm0, %v73_v11  ;;  %684 = vmatmul.msk.f32.gmra.mxu3 %vm91_vm0, %v73_v11 }
  0x32   :  { %668 = vmatmul.msk.f32.gmra.mxu1 %vm91_vm0, %v73_v11 }
  0x33   :  { %660 = vmatmul.msk.f32.gmra.mxu0 %vm91_vm0, %v73_v11 }
  0x39   :  { %677 = vmatmul.msk.f32.gmra.mxu2 %vm91_vm0, %v74_v12  ;;  %685 = vmatmul.msk.f32.gmra.mxu3 %vm91_vm0, %v74_v12 }
  0x3a   :  { %669 = vmatmul.msk.f32.gmra.mxu1 %vm91_vm0, %v74_v12 }
  0x3b   :  { %661 = vmatmul.msk.f32.gmra.mxu0 %vm91_vm0, %v74_v12 }
  0x41   :  { %678 = vmatmul.msk.f32.gmra.mxu2 %vm91_vm0, %v75_v13  ;;  %686 = vmatmul.msk.f32.gmra.mxu3 %vm91_vm0, %v75_v13 }
  0x42   :  { %670 = vmatmul.msk.f32.gmra.mxu1 %vm91_vm0, %v75_v13 }
  0x43   :  { %662 = vmatmul.msk.f32.gmra.mxu0 %vm91_vm0, %v75_v13 }
  0x49   :  { %679 = vmatmul.msk.f32.gmra.mxu2 %vm91_vm0, %v76_v14  ;;  %687 = vmatmul.msk.f32.gmra.mxu3 %vm91_vm0, %v76_v14 }
  0x4a   :  { %671 = vmatmul.msk.f32.gmra.mxu1 %vm91_vm0, %v76_v14 }
  0x4b   :  { %663 = vmatmul.msk.f32.gmra.mxu0 %vm91_vm0, %v76_v14 }
  0x8f   :  { %v174_v19 = vpop.f32.mrf.mxu1 }
  0x90   :  { %v133_v18 = vpop.f32.mrf.mxu0  ;;  %v175_v21 = vadd.f32 %v174_v19, %v1069_v17 }
  0x91   :  { %v134_v20 = vadd.f32 %v133_v18, %v1067_v16 }
  0x92   :  { %281 = vst [vmem:[#allocation4 + $0x8] sm:$0xff] %v175_v21 }
  0x93   :  { %280 = vst [vmem:[#allocation4] sm:$0xff] %v134_v20 }
  0x94   :  { %v215_v24 = vpop.f32.mrf.mxu2  ;;  %v256_v25 = vpop.f32.mrf.mxu3 }
  0x95   :  { %v216_v26 = vadd.f32 %v215_v24, %v1073_v22  ;;  %v257_v27 = vadd.f32 %v256_v25, %v1075_v23 }
  0x97   :  { %282 = vst [vmem:[#allocation4 + $0x10] sm:$0xff] %v216_v26  ;;  %v177_v29 = vpop.f32.mrf.mxu1 }
  0x98   :  { %283 = vst [vmem:[#allocation4 + $0x18] sm:$0xff] %v257_v27  ;;  %v136_v28 = vpop.f32.mrf.mxu0  ;;  %v178_v31 = vadd.f32 %v177_v29, %v1069_v17 }
  0x99   :  { %v137_v30 = vadd.f32 %v136_v28, %v1067_v16 }
  0x9a   :  { %285 = vst [vmem:[#allocation4 + $0x28] sm:$0xff] %v178_v31 }
  0x9b   :  { %284 = vst [vmem:[#allocation4 + $0x20] sm:$0xff] %v137_v30 }
  0x9c   :  { %v218_v32 = vpop.f32.mrf.mxu2  ;;  %v259_v33 = vpop.f32.mrf.mxu3 }
  0x9d   :  { %v219_v34 = vadd.f32 %v218_v32, %v1073_v22  ;;  %v260_v35 = vadd.f32 %v259_v33, %v1075_v23 }
  0x9f   :  { %286 = vst [vmem:[#allocation4 + $0x30] sm:$0xff] %v219_v34  ;;  %v180_v37 = vpop.f32.mrf.mxu1 }
  0xa0   :  { %287 = vst [vmem:[#allocation4 + $0x38] sm:$0xff] %v260_v35  ;;  %v139_v36 = vpop.f32.mrf.mxu0  ;;  %v181_v39 = vadd.f32 %v180_v37, %v1069_v17 }
  0xa1   :  { %v140_v38 = vadd.f32 %v139_v36, %v1067_v16 }
  0xa2   :  { %289 = vst [vmem:[#allocation4 + $0x48] sm:$0xff] %v181_v39 }
  0xa3   :  { %288 = vst [vmem:[#allocation4 + $0x40] sm:$0xff] %v140_v38 }
  0xa4   :  { %v221_v40 = vpop.f32.mrf.mxu2  ;;  %v262_v41 = vpop.f32.mrf.mxu3 }
  0xa5   :  { %v222_v42 = vadd.f32 %v221_v40, %v1073_v22  ;;  %v263_v43 = vadd.f32 %v262_v41, %v1075_v23 }
  0xa7   :  { %290 = vst [vmem:[#allocation4 + $0x50] sm:$0xff] %v222_v42  ;;  %v183_v45 = vpop.f32.mrf.mxu1 }
  0xa8   :  { %291 = vst [vmem:[#allocation4 + $0x58] sm:$0xff] %v263_v43  ;;  %v142_v44 = vpop.f32.mrf.mxu0  ;;  %v184_v47 = vadd.f32 %v183_v45, %v1069_v17 }
  0xa9   :  { %v143_v46 = vadd.f32 %v142_v44, %v1067_v16 }
  0xaa   :  { %293 = vst [vmem:[#allocation4 + $0x68] sm:$0xff] %v184_v47 }
  0xab   :  { %292 = vst [vmem:[#allocation4 + $0x60] sm:$0xff] %v143_v46 }
  0xac   :  { %v224_v48 = vpop.f32.mrf.mxu2  ;;  %v265_v49 = vpop.f32.mrf.mxu3 }
  0xad   :  { %v225_v50 = vadd.f32 %v224_v48, %v1073_v22  ;;  %v266_v51 = vadd.f32 %v265_v49, %v1075_v23 }
  0xaf   :  { %294 = vst [vmem:[#allocation4 + $0x70] sm:$0xff] %v225_v50  ;;  %v186_v53 = vpop.f32.mrf.mxu1 }
  0xb0   :  { %295 = vst [vmem:[#allocation4 + $0x78] sm:$0xff] %v266_v51  ;;  %v145_v52 = vpop.f32.mrf.mxu0  ;;  %v187_v55 = vadd.f32 %v186_v53, %v1069_v17 }
  0xb1   :  { %v146_v54 = vadd.f32 %v145_v52, %v1067_v16 }
  0xb2   :  { %297 = vst [vmem:[#allocation4 + $0x88] sm:$0xff] %v187_v55 }
  0xb3   :  { %296 = vst [vmem:[#allocation4 + $0x80] sm:$0xff] %v146_v54 }
  0xb4   :  { %v227_v56 = vpop.f32.mrf.mxu2  ;;  %v268_v57 = vpop.f32.mrf.mxu3 }
  0xb5   :  { %v228_v58 = vadd.f32 %v227_v56, %v1073_v22  ;;  %v269_v59 = vadd.f32 %v268_v57, %v1075_v23 }
  0xb7   :  { %298 = vst [vmem:[#allocation4 + $0x90] sm:$0xff] %v228_v58  ;;  %v189_v61 = vpop.f32.mrf.mxu1 }
  0xb8   :  { %299 = vst [vmem:[#allocation4 + $0x98] sm:$0xff] %v269_v59  ;;  %v148_v60 = vpop.f32.mrf.mxu0  ;;  %v190_v63 = vadd.f32 %v189_v61, %v1069_v17 }
  0xb9   :  { %v149_v62 = vadd.f32 %v148_v60, %v1067_v16 }
  0xba   :  { %301 = vst [vmem:[#allocation4 + $0xa8] sm:$0xff] %v190_v63 }
  0xbb   :  { %300 = vst [vmem:[#allocation4 + $0xa0] sm:$0xff] %v149_v62 }
  0xbc   :  { %v230_v0 = vpop.f32.mrf.mxu2  ;;  %v271_v1 = vpop.f32.mrf.mxu3 }
  0xbd   :  { %v231_v3 = vadd.f32 %v230_v0, %v1073_v22  ;;  %v272_v4 = vadd.f32 %v271_v1, %v1075_v23 }
  0xbf   :  { %302 = vst [vmem:[#allocation4 + $0xb0] sm:$0xff] %v231_v3  ;;  %v192_v6 = vpop.f32.mrf.mxu1 }
  0xc0   :  { %303 = vst [vmem:[#allocation4 + $0xb8] sm:$0xff] %v272_v4  ;;  %v151_v5 = vpop.f32.mrf.mxu0  ;;  %v193_v8 = vadd.f32 %v192_v6, %v1069_v17 }
  0xc1   :  { %v152_v7 = vadd.f32 %v151_v5, %v1067_v16 }
  0xc2   :  { %305 = vst [vmem:[#allocation4 + $0xc8] sm:$0xff] %v193_v8 }
  0xc3   :  { %304 = vst [vmem:[#allocation4 + $0xc0] sm:$0xff] %v152_v7 }
  0xc4   :  { %v233_v9 = vpop.f32.mrf.mxu2  ;;  %v274_v10 = vpop.f32.mrf.mxu3 }
  0xc5   :  { %v234_v11 = vadd.f32 %v233_v9, %v1073_v22  ;;  %v275_v12 = vadd.f32 %v274_v10, %v1075_v23 }
  0xc7   :  { %306 = vst [vmem:[#allocation4 + $0xd0] sm:$0xff] %v234_v11  ;;  %v195_v14 = vpop.f32.mrf.mxu1 }
  0xc8   :  { %307 = vst [vmem:[#allocation4 + $0xd8] sm:$0xff] %v275_v12  ;;  %v154_v13 = vpop.f32.mrf.mxu0  ;;  %v196_v18 = vadd.f32 %v195_v14, %v1069_v17 }
  0xc9   :  { %v155_v15 = vadd.f32 %v154_v13, %v1067_v16 }
  0xca   :  { %309 = vst [vmem:[#allocation4 + $0xe8] sm:$0xff] %v196_v18 }
  0xcb   :  { %308 = vst [vmem:[#allocation4 + $0xe0] sm:$0xff] %v155_v15 }
  0xcc   :  { %v236_v19 = vpop.f32.mrf.mxu2  ;;  %v277_v20 = vpop.f32.mrf.mxu3 }
  0xcd   :  { %v237_v21 = vadd.f32 %v236_v19, %v1073_v22  ;;  %v278_v24 = vadd.f32 %v277_v20, %v1075_v23 }
  0xcf   :  { %310 = vst [vmem:[#allocation4 + $0xf0] sm:$0xff] %v237_v21 }
  0xd0   :  { %311 = vst [vmem:[#allocation4 + $0xf8] sm:$0xff] %v278_v24 }
  0xd1 LB: > { %v395_v16 = vld [vmem:[#allocation6 + $0x1e0] sm:$0xff]  ;;  %v396_v25 = vld [vmem:[#allocation6 + $0x1e8] sm:$0xff]  ;;  %v397_v17 = vld [vmem:[#allocation6 + $0x1f0] sm:$0xff]  ;;  %v501_v15 = vstv %s904_s0  ;;  %s688_s4 = sshll.u32 %s904_s0, 3  ;;  %s322_s0 = sadd.s32 1, %s904_s0   ;;  %s904_s0 = sphi %s1107_s0, %s322_s0  }
  0xd2   : > { %399 = vmatpush.msra.mxu0 %v395_v16  ;;  %419 = vmatpush.msra.mxu1 %v396_v25  ;;  %v391_v26 = vld [vmem:[#allocation6 + $0x1c0] sm:$0xff]  ;;  %v392_v27 = vld [vmem:[#allocation6 + $0x1c8] sm:$0xff]  ;;  %v393_v28 = vld [vmem:[#allocation6 + $0x1d0] sm:$0xff]  ;;  %vm502_vm1 = vcmp.lt.s32.totalorder %v501_v15, %v994_v2  ;;  %s326_s19 = sshra.s32 %s688_s4, 3  ;;  %s513_s8 = scalar_lea.vmem [#allocation5], %s688_s4 }
  0xd3   : > { %439 = vmatpush.msra.mxu2 %v397_v17  ;;  %v387_v22 = vld [vmem:[#allocation6 + $0x1a0] sm:$0xff]  ;;  %v388_v23 = vld [vmem:[#allocation6 + $0x1a8] sm:$0xff]  ;;  %v389_v29 = vld [vmem:[#allocation6 + $0x1b0] sm:$0xff]  ;;  %v912_v17 = vmov 0   ;;  %s691_s7 = sshll.u32 %s326_s19, 5  ;;  %p319_p0 = scmp.ge.s32.totalorder %s322_s0, 8  }
  0xd4   : > { %400 = vmatpush.msra.mxu0 %v391_v26  ;;  %420 = vmatpush.msra.mxu1 %v392_v27  ;;  %v398_v30 = vld [vmem:[#allocation6 + $0x1f8] sm:$0xff]  ;;  %v383_v31 = vld [vmem:[#allocation6 + $0x180] sm:$0xff]  ;;  %v384_v32 = vld [vmem:[#allocation6 + $0x188] sm:$0xff]  ;;  %v503_v26 = vsel %vm502_vm1, 1, %v912_v17  ;;  %s330_s20 = scalar_lea.vmem [#allocation4], %s691_s7  ;;  %s913_s1 = smov (%p319_p0), [#allocation12]  }
  0xd5   : > { %440 = vmatpush.msra.mxu2 %v393_v28  ;;  %459 = vmatpush.msra.mxu3 %v398_v30  ;;  %v394_v33 = vld [vmem:[#allocation6 + $0x1d8] sm:$0xff]  ;;  %v385_v34 = vld [vmem:[#allocation6 + $0x190] sm:$0xff]  ;;  %v379_v36 = vld [vmem:[#allocation6 + $0x160] sm:$0xff]  ;;  %s614_s21 = sshll.u32 (%p319_p0), %s913_s1, 4  ;;  %s616_s24 = sshll.u32 (%p319_p0), %s1154_s10, 4  ;;  %s615_s21 = int_to_ptr.vmem [resolvable:$true] %s614_s21  ;;  %s617_s24 = int_to_ptr.hbm [resolvable:$true] %s616_s24 }
  0xd6   : > { %401 = vmatpush.msra.mxu0 %v387_v22  ;;  %421 = vmatpush.msra.mxu1 %v388_v23  ;;  %v390_v35 = vld [vmem:[#allocation6 + $0x1b8] sm:$0xff]  ;;  %v380_v37 = vld [vmem:[#allocation6 + $0x168] sm:$0xff]  ;;  %v381_v38 = vld [vmem:[#allocation6 + $0x170] sm:$0xff]  ;;  %s914_s2 = smov (%p319_p0), [#allocation14]   ;;  %s627_s28 = sshll.u32 (%p319_p0), %s1155_s11, 4  ;;  %s628_s28 = int_to_ptr.hbm [resolvable:$true] %s627_s28 }
  0xd7   : > { %441 = vmatpush.msra.mxu2 %v389_v29  ;;  %460 = vmatpush.msra.mxu3 %v394_v33  ;;  %v386_v39 = vld [vmem:[#allocation6 + $0x198] sm:$0xff]  ;;  %v375_v40 = vld [vmem:[#allocation6 + $0x140] sm:$0xff]  ;;  %v376_v41 = vld [vmem:[#allocation6 + $0x148] sm:$0xff]  ;;  %s625_s25 = sshll.u32 (%p319_p0), %s914_s2, 4  ;;  %s915_s10 = smov (%p319_p0), [#allocation11]   ;;  %s626_s25 = int_to_ptr.vmem [resolvable:$true] %s625_s25 }
  0xd8   : > { %402 = vmatpush.msra.mxu0 %v383_v31  ;;  %422 = vmatpush.msra.mxu1 %v384_v32  ;;  %v377_v42 = vld [vmem:[#allocation6 + $0x150] sm:$0xff]  ;;  %v382_v43 = vld [vmem:[#allocation6 + $0x178] sm:$0xff]  ;;  %v371_v44 = vld [vmem:[#allocation6 + $0x120] sm:$0xff]  ;;  %s600_s11 = sshll.u32 (%p319_p0), %s915_s10, 4  ;;  %s602_s13 = sshll.u32 (%p319_p0), %s1153_s9, 4  ;;  %s601_s11 = int_to_ptr.vmem [resolvable:$true] %s600_s11  ;;  %s603_s13 = int_to_ptr.hbm [resolvable:$true] %s602_s13 }
  0xd9   : > { %442 = vmatpush.msra.mxu2 %v385_v34  ;;  %461 = vmatpush.msra.mxu3 %v390_v35  ;;  %v372_v45 = vld [vmem:[#allocation6 + $0x128] sm:$0xff]  ;;  %v373_v46 = vld [vmem:[#allocation6 + $0x130] sm:$0xff]  ;;  %v378_v47 = vld [vmem:[#allocation6 + $0x158] sm:$0xff] }
  0xda   : > { %403 = vmatpush.msra.mxu0 %v379_v36  ;;  %423 = vmatpush.msra.mxu1 %v380_v37  ;;  %v367_v48 = vld [vmem:[#allocation6 + $0x100] sm:$0xff]  ;;  %v368_v49 = vld [vmem:[#allocation6 + $0x108] sm:$0xff]  ;;  %v369_v50 = vld [vmem:[#allocation6 + $0x110] sm:$0xff] }
  0xdb   : > { %443 = vmatpush.msra.mxu2 %v381_v38  ;;  %462 = vmatpush.msra.mxu3 %v386_v39  ;;  %v374_v51 = vld [vmem:[#allocation6 + $0x138] sm:$0xff]  ;;  %v363_v52 = vld [vmem:[#allocation6 + $0xe0] sm:$0xff]  ;;  %v364_v53 = vld [vmem:[#allocation6 + $0xe8] sm:$0xff] }
  0xdc   : > { %404 = vmatpush.msra.mxu0 %v375_v40  ;;  %424 = vmatpush.msra.mxu1 %v376_v41  ;;  %v365_v54 = vld [vmem:[#allocation6 + $0xf0] sm:$0xff]  ;;  %v370_v55 = vld [vmem:[#allocation6 + $0x118] sm:$0xff]  ;;  %v359_v56 = vld [vmem:[#allocation6 + $0xc0] sm:$0xff] }
  0xdd   : > { %444 = vmatpush.msra.mxu2 %v377_v42  ;;  %463 = vmatpush.msra.mxu3 %v382_v43  ;;  %v360_v57 = vld [vmem:[#allocation6 + $0xc8] sm:$0xff]  ;;  %v361_v58 = vld [vmem:[#allocation6 + $0xd0] sm:$0xff]  ;;  %v366_v59 = vld [vmem:[#allocation6 + $0xf8] sm:$0xff] }
  0xde   : > { %405 = vmatpush.msra.mxu0 %v371_v44  ;;  %425 = vmatpush.msra.mxu1 %v372_v45  ;;  %v355_v60 = vld [vmem:[#allocation6 + $0xa0] sm:$0xff]  ;;  %v356_v61 = vld [vmem:[#allocation6 + $0xa8] sm:$0xff]  ;;  %v357_v62 = vld [vmem:[#allocation6 + $0xb0] sm:$0xff] }
  0xdf   : > { %445 = vmatpush.msra.mxu2 %v373_v46  ;;  %464 = vmatpush.msra.mxu3 %v378_v47  ;;  %v362_v63 = vld [vmem:[#allocation6 + $0xd8] sm:$0xff]  ;;  %v351_v0 = vld [vmem:[#allocation6 + $0x80] sm:$0xff]  ;;  %v352_v1 = vld [vmem:[#allocation6 + $0x88] sm:$0xff] }
  0xe0   : > { %406 = vmatpush.msra.mxu0 %v367_v48  ;;  %426 = vmatpush.msra.mxu1 %v368_v49  ;;  %v353_v3 = vld [vmem:[#allocation6 + $0x90] sm:$0xff]  ;;  %v358_v4 = vld [vmem:[#allocation6 + $0xb8] sm:$0xff]  ;;  %v347_v5 = vld [vmem:[#allocation6 + $0x60] sm:$0xff] }
  0xe1   : > { %446 = vmatpush.msra.mxu2 %v369_v50  ;;  %465 = vmatpush.msra.mxu3 %v374_v51  ;;  %v348_v6 = vld [vmem:[#allocation6 + $0x68] sm:$0xff]  ;;  %v349_v7 = vld [vmem:[#allocation6 + $0x70] sm:$0xff]  ;;  %v354_v8 = vld [vmem:[#allocation6 + $0x98] sm:$0xff] }
  0xe2   : > { %407 = vmatpush.msra.mxu0 %v363_v52  ;;  %427 = vmatpush.msra.mxu1 %v364_v53  ;;  %v343_v9 = vld [vmem:[#allocation6 + $0x40] sm:$0xff]  ;;  %v344_v10 = vld [vmem:[#allocation6 + $0x48] sm:$0xff]  ;;  %v345_v11 = vld [vmem:[#allocation6 + $0x50] sm:$0xff] }
  0xe3   : > { %447 = vmatpush.msra.mxu2 %v365_v54  ;;  %466 = vmatpush.msra.mxu3 %v370_v55  ;;  %v350_v12 = vld [vmem:[#allocation6 + $0x78] sm:$0xff]  ;;  %v339_v13 = vld [vmem:[#allocation6 + $0x20] sm:$0xff]  ;;  %v340_v14 = vld [vmem:[#allocation6 + $0x28] sm:$0xff] }
  0xe4   : > { %408 = vmatpush.msra.mxu0 %v359_v56  ;;  %428 = vmatpush.msra.mxu1 %v360_v57  ;;  %v341_v18 = vld [vmem:[#allocation6 + $0x30] sm:$0xff]  ;;  %v346_v19 = vld [vmem:[#allocation6 + $0x58] sm:$0xff]  ;;  %v335_v20 = vld [vmem:[#allocation6] sm:$0xff] }
  0xe5   : > { %448 = vmatpush.msra.mxu2 %v361_v58  ;;  %467 = vmatpush.msra.mxu3 %v366_v59  ;;  %v336_v21 = vld [vmem:[#allocation6 + $0x8] sm:$0xff]  ;;  %v337_v24 = vld [vmem:[#allocation6 + $0x10] sm:$0xff]  ;;  %v342_v25 = vld [vmem:[#allocation6 + $0x38] sm:$0xff] }
  0xe6   : > { %409 = vmatpush.msra.mxu0 %v355_v60  ;;  %429 = vmatpush.msra.mxu1 %v356_v61  ;;  %v1113_v16 = vld [vmem:[#allocation2] sm:$0xff]  ;;  %v338_v27 = vld [vmem:[#allocation6 + $0x18] sm:$0xff]  ;;  %v333_v34 = vld [vmem:[%s330_s20 + $0x10] sm:$0xff] }
  0xe7   : > { %449 = vmatpush.msra.mxu2 %v357_v62  ;;  %468 = vmatpush.msra.mxu3 %v362_v63  ;;  %v331_v28 = vld [vmem:[%s330_s20] sm:$0xff]  ;;  %v332_v22 = vld [vmem:[%s330_s20 + $0x8] sm:$0xff]  ;;  %v334_v37 = vld [vmem:[%s330_s20 + $0x18] sm:$0xff] }
  0xe8   : > { %410 = vmatpush.msra.mxu0 %v351_v0  ;;  %430 = vmatpush.msra.mxu1 %v352_v1  ;;  %v325_v46 = vld [vmem:[#allocation3] sm:$0xff]  ;;  %v537_v62 = vld [vmem:[#allocation9 + $0x70] sm:$0xff] (%p319_p0)  ;;  %v536_v63 = vld [vmem:[#allocation9 + $0x68] sm:$0xff] (%p319_p0) }
  0xe9   : > { %450 = vmatpush.msra.mxu2 %v353_v3  ;;  %469 = vmatpush.msra.mxu3 %v358_v4  ;;  %v538_v61 = vld [vmem:[#allocation9 + $0x78] sm:$0xff] (%p319_p0)  ;;  %v535_v0 = vld [vmem:[#allocation9 + $0x60] sm:$0xff] (%p319_p0)  ;;  %v533_v3 = vld [vmem:[#allocation9 + $0x50] sm:$0xff] (%p319_p0) }
  0xea   : > { %411 = vmatpush.msra.mxu0 %v347_v5  ;;  %431 = vmatpush.msra.mxu1 %v348_v6  ;;  %v534_v1 = vld [vmem:[#allocation9 + $0x58] sm:$0xff] (%p319_p0)  ;;  %v532_v2 = vld [vmem:[#allocation9 + $0x48] sm:$0xff] (%p319_p0)  ;;  %v531_v4 = vld [vmem:[#allocation9 + $0x40] sm:$0xff] (%p319_p0) }
  0xeb   : > { %451 = vmatpush.msra.mxu2 %v349_v7  ;;  %470 = vmatpush.msra.mxu3 %v354_v8  ;;  %v530_v5 = vld [vmem:[#allocation9 + $0x38] sm:$0xff] (%p319_p0)  ;;  %v529_v6 = vld [vmem:[#allocation9 + $0x30] sm:$0xff] (%p319_p0)  ;;  %v528_v7 = vld [vmem:[#allocation9 + $0x28] sm:$0xff] (%p319_p0) }
  0xec   : > { %412 = vmatpush.msra.mxu0 %v343_v9  ;;  %432 = vmatpush.msra.mxu1 %v344_v10  ;;  %v527_v8 = vld [vmem:[#allocation9 + $0x20] sm:$0xff] (%p319_p0)  ;;  %v526_v9 = vld [vmem:[#allocation9 + $0x18] sm:$0xff] (%p319_p0)  ;;  %v525_v10 = vld [vmem:[#allocation9 + $0x10] sm:$0xff] (%p319_p0) }
  0xed   : > { %452 = vmatpush.msra.mxu2 %v345_v11  ;;  %471 = vmatpush.msra.mxu3 %v350_v12  ;;  %v524_v11 = vld [vmem:[#allocation9 + $0x8] sm:$0xff] (%p319_p0)  ;;  %v523_v12 = vld [vmem:[#allocation9] sm:$0xff] (%p319_p0) }
  0xee   : > { %413 = vmatpush.msra.mxu0 %v339_v13  ;;  %433 = vmatpush.msra.mxu1 %v340_v14 }
  0xef   : > { %453 = vmatpush.msra.mxu2 %v341_v18  ;;  %472 = vmatpush.msra.mxu3 %v346_v19 }
  0xf0   : > { %414 = vmatpush.msra.mxu0 %v335_v20  ;;  %434 = vmatpush.msra.mxu1 %v336_v21 }
  0xf1   : > { %454 = vmatpush.msra.mxu2 %v337_v24  ;;  %415 = vmatmul.f32.vlgmr.msra.gmra.mxu0 %v1113_v16 }
  0xf2   : > { %435 = vmatmul.f32.vlgmr.msra.gmra.mxu1 %v1113_v16  ;;  %455 = vmatmul.f32.vlgmr.msra.gmra.mxu2 %v1113_v16 }
  0xf3   : > { %473 = vmatpush.msra.mxu3 %v342_v25  ;;  %758 = vset.pattern.permute.xlu0 %v912_v17  ;;  %v769_v17 = vld [vmem:[%s1150_s6] ss:$0 sm:$0xff] (%p319_p0) }
  0xf4   : > { %505 = vperm.xlu0 %758, %v503_v26   ;;  %693 = vmatpush.msra.mxu2 (%p319_p0), %v538_v61 }
  0xf5   : > { %474 = vmatpush.msra.mxu3 %v338_v27  ;;  %543 = vmatpush.msra.mxu0 (%p319_p0), %v538_v61 }
  0xf6   : > { %475 = vmatmul.f32.vlgmr.msra.gmra.mxu3 %v1113_v16  ;;  %692 = vmatpush.msra.mxu1 (%p319_p0), %v538_v61 }
  0xf7   :  { %694 = vmatpush.msra.mxu3 (%p319_p0), %v538_v61  ;;  %696 = vmatpush.msra.mxu2 (%p319_p0), %v537_v62 }
  0xf8   :  { %544 = vmatpush.msra.mxu0 (%p319_p0), %v537_v62  ;;  %695 = vmatpush.msra.mxu1 (%p319_p0), %v537_v62 }
  0xf9   :  { %697 = vmatpush.msra.mxu3 (%p319_p0), %v537_v62  ;;  %699 = vmatpush.msra.mxu2 (%p319_p0), %v536_v63 }
  0xfa   :  { %545 = vmatpush.msra.mxu0 (%p319_p0), %v536_v63  ;;  %698 = vmatpush.msra.mxu1 (%p319_p0), %v536_v63 }
  0xfb   :  { %700 = vmatpush.msra.mxu3 (%p319_p0), %v536_v63  ;;  %702 = vmatpush.msra.mxu2 (%p319_p0), %v535_v0 }
  0xfc   :  { %546 = vmatpush.msra.mxu0 (%p319_p0), %v535_v0  ;;  %701 = vmatpush.msra.mxu1 (%p319_p0), %v535_v0 }
  0xfd   :  { %703 = vmatpush.msra.mxu3 (%p319_p0), %v535_v0  ;;  %705 = vmatpush.msra.mxu2 (%p319_p0), %v534_v1 }
  0xfe   :  { %547 = vmatpush.msra.mxu0 (%p319_p0), %v534_v1  ;;  %704 = vmatpush.msra.mxu1 (%p319_p0), %v534_v1 }
  0xff   :  { %706 = vmatpush.msra.mxu3 (%p319_p0), %v534_v1  ;;  %708 = vmatpush.msra.mxu2 (%p319_p0), %v533_v3 }
 0x100   :  { %548 = vmatpush.msra.mxu0 (%p319_p0), %v533_v3  ;;  %707 = vmatpush.msra.mxu1 (%p319_p0), %v533_v3 }
 0x101   :  { %709 = vmatpush.msra.mxu3 (%p319_p0), %v533_v3  ;;  %711 = vmatpush.msra.mxu2 (%p319_p0), %v532_v2 }
 0x102   :  { %549 = vmatpush.msra.mxu0 (%p319_p0), %v532_v2  ;;  %710 = vmatpush.msra.mxu1 (%p319_p0), %v532_v2 }
 0x103   :  { %712 = vmatpush.msra.mxu3 (%p319_p0), %v532_v2  ;;  %714 = vmatpush.msra.mxu2 (%p319_p0), %v531_v4 }
 0x104   :  { %550 = vmatpush.msra.mxu0 (%p319_p0), %v531_v4  ;;  %713 = vmatpush.msra.mxu1 (%p319_p0), %v531_v4 }
 0x105   :  { %715 = vmatpush.msra.mxu3 (%p319_p0), %v531_v4  ;;  %717 = vmatpush.msra.mxu2 (%p319_p0), %v530_v5 }
 0x106   :  { %551 = vmatpush.msra.mxu0 (%p319_p0), %v530_v5  ;;  %716 = vmatpush.msra.mxu1 (%p319_p0), %v530_v5 }
 0x107   :  { %718 = vmatpush.msra.mxu3 (%p319_p0), %v530_v5  ;;  %720 = vmatpush.msra.mxu2 (%p319_p0), %v529_v6 }
 0x108   :  { %552 = vmatpush.msra.mxu0 (%p319_p0), %v529_v6  ;;  %719 = vmatpush.msra.mxu1 (%p319_p0), %v529_v6 }
 0x109   :  { %721 = vmatpush.msra.mxu3 (%p319_p0), %v529_v6  ;;  %723 = vmatpush.msra.mxu2 (%p319_p0), %v528_v7 }
 0x10a   :  { %553 = vmatpush.msra.mxu0 (%p319_p0), %v528_v7  ;;  %722 = vmatpush.msra.mxu1 (%p319_p0), %v528_v7 }
 0x10b   :  { %724 = vmatpush.msra.mxu3 (%p319_p0), %v528_v7  ;;  %726 = vmatpush.msra.mxu2 (%p319_p0), %v527_v8 }
 0x10c   :  { %554 = vmatpush.msra.mxu0 (%p319_p0), %v527_v8  ;;  %725 = vmatpush.msra.mxu1 (%p319_p0), %v527_v8 }
 0x10d   :  { %727 = vmatpush.msra.mxu3 (%p319_p0), %v527_v8  ;;  %729 = vmatpush.msra.mxu2 (%p319_p0), %v526_v9 }
 0x10e   :  { %555 = vmatpush.msra.mxu0 (%p319_p0), %v526_v9  ;;  %728 = vmatpush.msra.mxu1 (%p319_p0), %v526_v9 }
 0x10f   :  { %730 = vmatpush.msra.mxu3 (%p319_p0), %v526_v9  ;;  %732 = vmatpush.msra.mxu2 (%p319_p0), %v525_v10 }
 0x110   :  { %556 = vmatpush.msra.mxu0 (%p319_p0), %v525_v10  ;;  %731 = vmatpush.msra.mxu1 (%p319_p0), %v525_v10 }
 0x111   :  { %733 = vmatpush.msra.mxu3 (%p319_p0), %v525_v10  ;;  %735 = vmatpush.msra.mxu2 (%p319_p0), %v524_v11 }
 0x112   :  { %557 = vmatpush.msra.mxu0 (%p319_p0), %v524_v11  ;;  %734 = vmatpush.msra.mxu1 (%p319_p0), %v524_v11 }
 0x113   :  { %736 = vmatpush.msra.mxu3 (%p319_p0), %v524_v11  ;;  %738 = vmatpush.msra.mxu2 (%p319_p0), %v523_v12 }
 0x114   :  { %558 = vmatpush.msra.mxu0 (%p319_p0), %v523_v12  ;;  %737 = vmatpush.msra.mxu1 (%p319_p0), %v523_v12 }
 0x115   :  { %739 = vmatpush.msra.mxu3 (%p319_p0), %v523_v12 }
 0x166   : > { %v506_v48 = vpop.permute.xlu0 %505 }
 0x167   : > { %vm507_vm2 = vcmp.eq.s32.totalorder %v506_v48, 1 }
 0x16e   : > { %v416_v23 = vpop.f32.mrf.mxu0 }
 0x16f   : > { %v479_v29 = vadd.f32 %v416_v23, %v331_v28  ;;  %v436_v30 = vpop.f32.mrf.mxu1 }
 0x170   : > { %v480_v31 = vadd.f32 %v436_v30, %v332_v22 }
 0x171   : > { %v483_v32 = vmul.f32 0.5, %v479_v29 }
 0x172   : > { %v487_v33 = vmul.f32 0.5, %v480_v31 }
 0x173   : > { %759 = vtanh.f32 %v483_v32 }
 0x174   : > { %761 = vtanh.f32 %v487_v33 }
 0x175   : > { %v456_v35 = vpop.f32.mrf.mxu2 }
 0x176   : > { %v481_v36 = vadd.f32 %v456_v35, %v333_v34 }
 0x178   : > { %763 = vtanh.f32 %v481_v36 }
 0x179   : > { %v760_v38 = vpop.eup %759  ;;  %v476_v39 = vpop.f32.mrf.mxu3 }
 0x17a   : > { %v762_v40 = vpop.eup %761  ;;  %v485_v41 = vadd.f32 1.0, %v760_v38  ;;  %v482_v42 = vadd.f32 %v476_v39, %v334_v37 }
 0x17b   : > { %v489_v43 = vadd.f32 1.0, %v762_v40 }
 0x17c   : > { %v486_v44 = vmul.f32 0.5, %v485_v41  ;;  %v492_v45 = vmul.f32 0.5, %v482_v42 }
 0x17d   : > { %v490_v47 = vmul.f32 0.5, %v489_v43 }
 0x17e   : > { %v764_v49 = vpop.eup %763  ;;  %765 = vtanh.f32 %v492_v45 }
 0x17f   : > { %v497_v50 = vmul.f32 %v764_v49, %v486_v44  ;;  %v496_v51 = vmul.f32 %v490_v47, %v325_v46 }
 0x181   : > { %v498_v52 = vadd.f32 %v497_v50, %v496_v51 }
 0x183   : > { %767 = vtanh.f32 %v498_v52  ;;  %v510_v53 = vsel %vm507_vm2, %v498_v52, %v325_v46 }
 0x184   : > { %v766_v54 = vpop.eup %765  ;;  %511 = vst [vmem:[#allocation3] sm:$0xff] %v510_v53 }
 0x185   : > { %v494_v55 = vadd.f32 1.0, %v766_v54 }
 0x187   : > { %v495_v56 = vmul.f32 0.5, %v494_v55 }
 0x189   : > { %v768_v57 = vpop.eup %767 }
 0x18a   : > { %v500_v58 = vmul.f32 %v768_v57, %v495_v56  ;;  %321 = sbr.rel (!%p319_p0) target bundleno = 209 (0xd1), region = 89 }
 0x18b   :  { %v594_v25 = vld [vmem:[#allocation3] sm:$0xff] (%p319_p0) }
 0x18c   : > { %v508_v59 = vsel %vm507_vm2, %v500_v58, %v1113_v16  ;;  %v512_v60 = vsel %vm507_vm2, %v500_v58, 0.0  ;;  %595 = vst [vmem:[#allocation14] sm:$0xff] (%p319_p0), %v594_v25 }
 0x18d   : > { %509 = vst [vmem:[#allocation2] sm:$0xff] %v508_v59 }
 0x18e   : > { %514 = vst [vmem:[%s513_s8] sm:$0xff] %v512_v60 }
 0x194   :  { %v592_v16 = vld [vmem:[#allocation2] sm:$0xff] }
 0x195   :  { %v519_v13 = vld [vmem:[#allocation5 + $0x20] sm:$0xff]  ;;  %v521_v14 = vld [vmem:[#allocation5 + $0x30] sm:$0xff]  ;;  %v520_v19 = vld [vmem:[#allocation5 + $0x28] sm:$0xff]  ;;  %593 = vst [vmem:[#allocation12] sm:$0xff] %v592_v16 }
 0x196   :  { %v515_v15 = vld [vmem:[#allocation5] sm:$0xff]  ;;  %v517_v18 = vld [vmem:[#allocation5 + $0x10] sm:$0xff]  ;;  %571 = vmatmul.f32.vlgmr.msra.gmra.mxu2 %v519_v13  ;;  %577 = vmatmul.f32.vlgmr.msra.gmra.mxu3 %v521_v14  ;;  %v522_v20 = vld [vmem:[#allocation5 + $0x38] sm:$0xff]  ;;  %619 = dma.vmem_to_hbm [thread:$0]  %s615_s21, 128, %s617_s24, [#allocation13]  }
 0x197   :  { %559 = vmatmul.f32.vlgmr.msra.gmra.mxu0 %v515_v15  ;;  %565 = vmatmul.f32.vlgmr.msra.gmra.mxu1 %v517_v18  ;;  %v516_v21 = vld [vmem:[#allocation5 + $0x8] sm:$0xff]  ;;  %v518_v24 = vld [vmem:[#allocation5 + $0x18] sm:$0xff]  ;;  %630 = dma.vmem_to_hbm [thread:$0]  %s626_s25, 128, %s628_s28, [#allocation13]  }
 0x19e   :  { %574 = vmatmul.f32.gmra.mxu2 %v520_v19  ;;  %580 = vmatmul.f32.gmra.mxu3 %v522_v20 }
 0x19f   :  { %562 = vmatmul.f32.gmra.mxu0 %v516_v21  ;;  %568 = vmatmul.f32.gmra.mxu1 %v518_v24 }
 0x214   :  { %v560_v26 = vpop.f32.mrf.mxu0  ;;  %v566_v27 = vpop.f32.mrf.mxu1 }
 0x215   :  { %v561_v28 = vadd.f32 %v769_v17, %v560_v26  ;;  %v567_v22 = vadd.f32 %v769_v17, %v566_v27 }
 0x217   :  { %584 = vst [vmem:[#allocation11] sm:$0xff] %v561_v28 }
 0x218   :  { %586 = vst [vmem:[#allocation11 + $0x10] sm:$0xff] %v567_v22 }
 0x219   :  { %v572_v23 = vpop.f32.mrf.mxu2  ;;  %v578_v29 = vpop.f32.mrf.mxu3 }
 0x21a   :  { %v573_v30 = vadd.f32 %v769_v17, %v572_v23  ;;  %v579_v31 = vadd.f32 %v769_v17, %v578_v29 }
 0x21c   :  { %588 = vst [vmem:[#allocation11 + $0x20] sm:$0xff] %v573_v30  ;;  %v563_v32 = vpop.f32.mrf.mxu0  ;;  %v569_v33 = vpop.f32.mrf.mxu1 }
 0x21d   :  { %590 = vst [vmem:[#allocation11 + $0x30] sm:$0xff] %v579_v31  ;;  %v564_v34 = vadd.f32 %v769_v17, %v563_v32  ;;  %v570_v35 = vadd.f32 %v769_v17, %v569_v33 }
 0x21f   :  { %585 = vst [vmem:[#allocation11 + $0x8] sm:$0xff] %v564_v34 }
 0x220   :  { %587 = vst [vmem:[#allocation11 + $0x18] sm:$0xff] %v570_v35 }
 0x221   :  { %v575_v36 = vpop.f32.mrf.mxu2  ;;  %v581_v37 = vpop.f32.mrf.mxu3 }
 0x222   :  { %v576_v38 = vadd.f32 %v769_v17, %v575_v36  ;;  %v582_v39 = vadd.f32 %v769_v17, %v581_v37 }
 0x224   :  { %589 = vst [vmem:[#allocation11 + $0x28] sm:$0xff] %v576_v38 }
 0x225   :  { %591 = vst [vmem:[#allocation11 + $0x38] sm:$0xff] %v582_v39 }
 0x226   :  { %608 = dma.vmem_to_hbm [thread:$0]  %s601_s11, 1024, %s603_s13, [#allocation8], %s910_s29, %s910_s29, %s911_s30  }
 0x227   :  { %898 = dma.done.wait [#allocation8], 1024  }
 0x228   :  { %899 = vsyncadd [#allocation8], 4294966272 }
 0x229   :  { %900 = dma.done.wait [#allocation13], 256  }
 0x22a   :  { %901 = vsyncadd [#allocation13], 4294967040 }
 0x22b   :  { %643 = vsyncpa [#allocation7], 1 }
 0x22c   :  { %644 = vsyncpa [#allocation10], 1 }
 0x22d   :  { %645 = vsyncpa [#allocation8], 1 }
 0x22e   :  { %646 = vsyncpa [#allocation13], 1 }

</bundles_post_ra>
